<compile_context>
chip_gen: v5e
topology: v5e:2x2
jax: 0.10.0
libtpu: 0.0.40
codegen_flags: <defaults>
</compile_context>

<pallas_src>
import numpy as np
import jax
import jax.numpy as jnp
from jax.experimental import pallas as pl
from jax.experimental.pallas import tpu as pltpu

# ----------------------------- hyper-parameters ------------------------------
B = 2                 # batch
AHA_NUM = 16          # V_ecc
V_ECC = AHA_NUM
V_ERR = AHA_NUM - 4   # 12
TF_NUM = 8            # T  (time points; tf_num)
TEMPORAL_OUT = 8      # C  (conv out channels)
GCN_OUT = 64          # fixed by module when temporal_out > 0
HIDDEN = 32           # hidden_size
FEAT = TEMPORAL_OUT * TF_NUM   # temporal_out_channels = C*T = 64
H2 = 2 * HIDDEN                # 64
K_E = V_ECC * TF_NUM           # 128  (ecc flattened input dim)
K_R = V_ERR * TF_NUM           # 96   (err flattened input dim)

# packed-parameter row layout (single bf16 operand, 240 x 64)
MISC = K_E + K_R               # 224: start of the misc block
ROWS = MISC + 16               # 240: misc block padded to a full bf16 sublane tile
R_CE, R_CR, R_WA, R_WF, R_BA, R_BF = 0, 1, 2, 3, 4, 5   # rows within misc chunk


# --------------------------------- kernel ------------------------------------
def _sigmoid(x):
    # exact sigmoid via a single EUP tanh (no exp overflow, no approx recip)
    return 0.5 * (jnp.tanh(0.5 * x) + 1.0)


def _dual_stgcn_kernel(xe_ref, xr_ref, p_ref, out_ref):
    # Branch front ends: two bf16 MXU matmuls with f32 accumulation.
    xe = xe_ref[...].astype(jnp.bfloat16)                       # (B, 128)
    xr = xr_ref[...].astype(jnp.bfloat16)                       # (B, 96)
    eg = jnp.dot(xe, p_ref[0:K_E, :],
                 preferred_element_type=jnp.float32)            # (B, 64)
    rg = jnp.dot(xr, p_ref[K_E:K_E + K_R, :],
                 preferred_element_type=jnp.float32)            # (B, 64)

    # Misc rows (biases + head weights), one aligned 16-row load -> f32.
    misc = p_ref[MISC:MISC + 16, :].astype(jnp.float32)         # (16, 64)
    eg = eg + misc[R_CE:R_CE + 1, :]                            # + c_e
    rg = rg + misc[R_CR:R_CR + 1, :]                            # + c_r

    # Gated fusion.  Head mat-vecs as VPU mul + lane reduce (no N=1 MXU ops);
    # head bias is pre-divided by H2 so the reduction adds it back exactly once.
    t = jnp.tanh(eg + rg)
    attn_logit = jnp.sum(t * misc[R_WA:R_WA + 1, :] + misc[R_BA:R_BA + 1, :],
                         axis=-1, keepdims=True)                # (B, 1)
    attn = _sigmoid(attn_logit)
    fused = attn * eg + (1.0 - attn) * rg                       # latent_layer

    x = jnp.maximum(fused, 0.0)                                 # relu; dropout=identity (eval)
    logit = jnp.sum(x * misc[R_WF:R_WF + 1, :] + misc[R_BF:R_BF + 1, :],
                    axis=-1, keepdims=True)                     # (B, 1)
    out_ref[...] = _sigmoid(logit)


# ------------------------------ glue / folding --------------------------------
def cheb_operator(num_nodes):
    """Dense Lhat = 2L/lambda_max - I = -D^{-1/2} A D^{-1/2} for a ring graph."""
    A = np.zeros((num_nodes, num_nodes), np.float32)
    for i in range(num_nodes):          # deterministic edge_index: ring graph
        j = (i + 1) % num_nodes
        A[i, j] = 1.0
        A[j, i] = 1.0
    deg = A.sum(axis=1)
    dinv = 1.0 / np.sqrt(np.maximum(deg, 1e-12))
    return jnp.asarray(-(dinv[:, None] * A * dinv[None, :]))


def init_params(key):
    ks = jax.random.split(key, 18)
    rn = lambda k, s: 0.1 * jax.random.normal(k, s, dtype=jnp.float32)
    return dict(
        wconv_e=rn(ks[0], (TEMPORAL_OUT, 3)), bconv_e=rn(ks[1], (TEMPORAL_OUT,)),
        wconv_r=rn(ks[2], (TEMPORAL_OUT, 3)), bconv_r=rn(ks[3], (TEMPORAL_OUT,)),
        w0_e=rn(ks[4], (FEAT, GCN_OUT)), w1_e=rn(ks[5], (FEAT, GCN_OUT)),
        bg_e=rn(ks[6], (GCN_OUT,)),
        w0_r=rn(ks[7], (FEAT, GCN_OUT)), w1_r=rn(ks[8], (FEAT, GCN_OUT)),
        bg_r=rn(ks[9], (GCN_OUT,)),
        wproj_e=rn(ks[10], (V_ECC * GCN_OUT, H2)), bproj_e=rn(ks[11], (H2,)),
        wproj_r=rn(ks[12], (V_ERR * GCN_OUT, H2)), bproj_r=rn(ks[13], (H2,)),
        wattn=rn(ks[14], (H2, 1)), battn=rn(ks[15], (1,)),
        wfc2=rn(ks[16], (H2, 1)), bfc2=rn(ks[17], (1,)),
        L_e=cheb_operator(V_ECC), L_r=cheb_operator(V_ERR),
    )


def _conv1d(x2, w, b):
    """Conv1d(1->C, k=3, pad=1): x2 (N, T) -> (N, C, T), feature order c*T + t."""
    T = x2.shape[1]
    xp = jnp.pad(x2, ((0, 0), (1, 1)))
    cols = jnp.stack([xp[:, k:k + T] for k in range(3)], axis=-1)   # (N, T, 3)
    return jnp.einsum('ntk,ck->nct', cols, w) + b[None, :, None]


def _branch_affine(x_flat, wconv, bconv, L, w0, w1, bg, wproj, bproj, V, T):
    """Per-batch branch: conv -> ChebConv(K=2) -> flatten -> Linear (affine in x)."""
    x = x_flat.reshape(V, T)
    feat = _conv1d(x, wconv, bconv).reshape(V, -1)      # (V, C*T)
    g = feat @ w0 + (L @ feat) @ w1 + bg                # (V, GCN_OUT)
    return g.reshape(-1) @ wproj + bproj                # (H2,)


def fold_params(p):
    """Collapse each branch's affine front end to x_flat @ A + c and pack both
    branches + biases + head weights into ONE bf16 operand (no zero-padding of
    the contraction dim; 3 input DMAs total at call time)."""
    def fold(wconv, bconv, L, w0, w1, bg, wproj, bproj, V):
        fn = lambda xf: _branch_affine(xf, wconv, bconv, L, w0, w1, bg,
                                       wproj, bproj, V, TF_NUM)
        z = jnp.zeros((V * TF_NUM,), jnp.float32)
        c = fn(z)                                       # (H2,)
        A = jax.jacfwd(fn)(z).T                         # (V*T, H2), exact (affine)
        return A, c

    A_e, c_e = fold(p['wconv_e'], p['bconv_e'], p['L_e'], p['w0_e'], p['w1_e'],
                    p['bg_e'], p['wproj_e'], p['bproj_e'], V_ECC)
    A_r, c_r = fold(p['wconv_r'], p['bconv_r'], p['L_r'], p['w0_r'], p['w1_r'],
                    p['bg_r'], p['wproj_r'], p['bproj_r'], V_ERR)

    P = jnp.zeros((ROWS, H2), jnp.float32)
    P = P.at[0:K_E, :].set(A_e)
    P = P.at[K_E:K_E + K_R, :].set(A_r)
    P = P.at[MISC + R_CE, :].set(c_e)
    P = P.at[MISC + R_CR, :].set(c_r)
    P = P.at[MISC + R_WA, :].set(p['wattn'][:, 0])
    P = P.at[MISC + R_WF, :].set(p['wfc2'][:, 0])
    # head biases stored as b/H2 replicated over the lane dim: the in-kernel
    # lane reduction over H2 lanes re-sums them to exactly b.
    P = P.at[MISC + R_BA, :].set(jnp.full((H2,), p['battn'][0] / H2))
    P = P.at[MISC + R_BF, :].set(jnp.full((H2,), p['bfc2'][0] / H2))
    return P.astype(jnp.bfloat16)                       # (240, 64) bf16, ~30 KiB


def dual_stgcn_forward(ecc, err, packed):
    Bv = ecc.shape[0]
    xe = ecc.reshape(Bv, K_E)                           # free reshape, no concat/pad
    xr = err.reshape(Bv, K_R)
    vmem = pl.BlockSpec(memory_space=pltpu.MemorySpace.VMEM)
    return pl.pallas_call(
        _dual_stgcn_kernel,
        out_shape=jax.ShapeDtypeStruct((Bv, 1), jnp.float32),
        in_specs=[vmem, vmem, vmem],
        out_specs=vmem,
    )(xe, xr, packed)


# ------------------------------ pure-JAX reference ----------------------------
def ref_forward(ecc, err, p):
    Bv, Ve, T = ecc.shape
    Vr = err.shape[1]
    fe = _conv1d(ecc.reshape(Bv * Ve, T), p['wconv_e'], p['bconv_e']).reshape(Bv, Ve, -1)
    fr = _conv1d(err.reshape(Bv * Vr, T), p['wconv_r'], p['bconv_r']).reshape(Bv, Vr, -1)

    def cheb(x, L, w0, w1, bg):
        return x @ w0 + (L @ x) @ w1 + bg

    eo = jnp.stack([cheb(fe[i], p['L_e'], p['w0_e'], p['w1_e'], p['bg_e']) for i in range(Bv)])
    ro = jnp.stack([cheb(fr[i], p['L_r'], p['w0_r'], p['w1_r'], p['bg_r']) for i in range(Bv)])
    eg = eo.reshape(Bv, -1) @ p['wproj_e'] + p['bproj_e']
    rg = ro.reshape(Bv, -1) @ p['wproj_r'] + p['bproj_r']
    attn = jax.nn.sigmoid(jnp.tanh(eg + rg) @ p['wattn'] + p['battn'])
    fused = attn * eg + (1.0 - attn) * rg
    x = jax.nn.relu(fused)
    return jax.nn.sigmoid(x @ p['wfc2'] + p['bfc2'])


# ----------------------------------- main -------------------------------------
if __name__ == "__main__":
    key = jax.random.PRNGKey(0)
    kp, ke, kr = jax.random.split(key, 3)
    params = init_params(kp)
    packed = fold_params(params)

    ecc = jax.random.normal(ke, (B, V_ECC, TF_NUM), dtype=jnp.float32)
    err = jax.random.normal(kr, (B, V_ERR, TF_NUM), dtype=jnp.float32)

    out = dual_stgcn_forward(ecc, err, packed)
    out = jax.block_until_ready(out)
    assert out.shape == (B, 1), out.shape

    ref = np.asarray(ref_forward(ecc, err, params))
    np.testing.assert_allclose(np.asarray(out), ref, rtol=1e-2, atol=1e-2)
    print("KERNEL_OK")
</pallas_src>

<mosaic_0001>
module attributes {stable_mosaic.version = 11 : i64} {
  func.func @_dual_stgcn_kernel(%arg0: memref<2x128xf32, #tpu.memory_space<vmem>>, %arg1: memref<2x96xf32, #tpu.memory_space<vmem>>, %arg2: memref<240x64xbf16, #tpu.memory_space<vmem>>, %arg3: memref<2x1xf32, #tpu.memory_space<vmem>>) attributes {dimension_semantics = [], scalar_prefetch = 0 : i64, scratch_operands = 0 : i64, tpu.core_type = #tpu.core_type<tc>} {
    %c0 = arith.constant 0 : index
    %c0_0 = arith.constant 0 : index
    %0 = vector.load %arg0[%c0, %c0_0] : memref<2x128xf32, #tpu.memory_space<vmem>>, vector<2x128xf32>
    %1 = arith.truncf %0 : vector<2x128xf32> to vector<2x128xbf16>
    %c0_1 = arith.constant 0 : index
    %c0_2 = arith.constant 0 : index
    %2 = vector.load %arg1[%c0_1, %c0_2] : memref<2x96xf32, #tpu.memory_space<vmem>>, vector<2x96xf32>
    %3 = arith.truncf %2 : vector<2x96xf32> to vector<2x96xbf16>
    %c0_3 = arith.constant 0 : index
    %c0_4 = arith.constant 0 : index
    %4 = vector.load %arg2[%c0_3, %c0_4] : memref<240x64xbf16, #tpu.memory_space<vmem>>, vector<128x64xbf16>
    %cst = arith.constant dense<0.000000e+00> : vector<2x64xf32>
    %5 = tpu.matmul %1, %4, %cst {dimension_numbers = #tpu.dot_dimension_numbers<[1], [0], [0], [1], [0, 0, 1, 1], [], []>} : vector<2x128xbf16>, vector<128x64xbf16>, vector<2x64xf32> -> vector<2x64xf32>
    %c128 = arith.constant 128 : index
    %c0_5 = arith.constant 0 : index
    %6 = vector.load %arg2[%c128, %c0_5] : memref<240x64xbf16, #tpu.memory_space<vmem>>, vector<96x64xbf16>
    %cst_6 = arith.constant dense<0.000000e+00> : vector<2x64xf32>
    %7 = tpu.matmul %3, %6, %cst_6 {dimension_numbers = #tpu.dot_dimension_numbers<[1], [0], [0], [1], [0, 0, 1, 1], [], []>} : vector<2x96xbf16>, vector<96x64xbf16>, vector<2x64xf32> -> vector<2x64xf32>
    %c224 = arith.constant 224 : index
    %c0_7 = arith.constant 0 : index
    %8 = vector.load %arg2[%c224, %c0_7] : memref<240x64xbf16, #tpu.memory_space<vmem>>, vector<16x64xbf16>
    %9 = arith.extf %8 : vector<16x64xbf16> to vector<16x64xf32>
    %10 = vector.extract_strided_slice %9 {offsets = [0, 0], sizes = [1, 64], strides = [1, 1]} : vector<16x64xf32> to vector<1x64xf32>
    %11 = vector.broadcast %10 : vector<1x64xf32> to vector<2x64xf32>
    %12 = arith.addf %5, %11 : vector<2x64xf32>
    %13 = vector.extract_strided_slice %9 {offsets = [1, 0], sizes = [1, 64], strides = [1, 1]} : vector<16x64xf32> to vector<1x64xf32>
    %14 = vector.broadcast %13 : vector<1x64xf32> to vector<2x64xf32>
    %15 = arith.addf %7, %14 : vector<2x64xf32>
    %16 = arith.addf %12, %15 : vector<2x64xf32>
    %17 = math.tanh %16 : vector<2x64xf32>
    %18 = vector.extract_strided_slice %9 {offsets = [2, 0], sizes = [1, 64], strides = [1, 1]} : vector<16x64xf32> to vector<1x64xf32>
    %19 = vector.broadcast %18 : vector<1x64xf32> to vector<2x64xf32>
    %20 = arith.mulf %17, %19 : vector<2x64xf32>
    %21 = vector.extract_strided_slice %9 {offsets = [4, 0], sizes = [1, 64], strides = [1, 1]} : vector<16x64xf32> to vector<1x64xf32>
    %22 = vector.broadcast %21 : vector<1x64xf32> to vector<2x64xf32>
    %23 = arith.addf %20, %22 : vector<2x64xf32>
    %cst_8 = arith.constant dense<0.000000e+00> : vector<2xf32>
    %24 = vector.multi_reduction <add>, %23, %cst_8 [1] : vector<2x64xf32> to vector<2xf32>
    %25 = vector.shape_cast %24 : vector<2xf32> to vector<2x1xf32>
    %cst_9 = arith.constant 5.000000e-01 : f32
    %26 = vector.broadcast %cst_9 : f32 to vector<2x1xf32>
    %27 = arith.mulf %26, %25 : vector<2x1xf32>
    %28 = math.tanh %27 : vector<2x1xf32>
    %cst_10 = arith.constant 1.000000e+00 : f32
    %29 = vector.broadcast %cst_10 : f32 to vector<2x1xf32>
    %30 = arith.addf %28, %29 : vector<2x1xf32>
    %cst_11 = arith.constant 5.000000e-01 : f32
    %31 = vector.broadcast %cst_11 : f32 to vector<2x1xf32>
    %32 = arith.mulf %31, %30 : vector<2x1xf32>
    %33 = vector.broadcast %32 : vector<2x1xf32> to vector<2x64xf32>
    %34 = arith.mulf %33, %12 : vector<2x64xf32>
    %cst_12 = arith.constant 1.000000e+00 : f32
    %35 = vector.broadcast %cst_12 : f32 to vector<2x1xf32>
    %36 = arith.subf %35, %32 : vector<2x1xf32>
    %37 = vector.broadcast %36 : vector<2x1xf32> to vector<2x64xf32>
    %38 = arith.mulf %37, %15 : vector<2x64xf32>
    %39 = arith.addf %34, %38 : vector<2x64xf32>
    %cst_13 = arith.constant 0.000000e+00 : f32
    %40 = vector.broadcast %cst_13 : f32 to vector<2x64xf32>
    %41 = arith.maximumf %39, %40 : vector<2x64xf32>
    %42 = vector.extract_strided_slice %9 {offsets = [3, 0], sizes = [1, 64], strides = [1, 1]} : vector<16x64xf32> to vector<1x64xf32>
    %43 = vector.broadcast %42 : vector<1x64xf32> to vector<2x64xf32>
    %44 = arith.mulf %41, %43 : vector<2x64xf32>
    %45 = vector.extract_strided_slice %9 {offsets = [5, 0], sizes = [1, 64], strides = [1, 1]} : vector<16x64xf32> to vector<1x64xf32>
    %46 = vector.broadcast %45 : vector<1x64xf32> to vector<2x64xf32>
    %47 = arith.addf %44, %46 : vector<2x64xf32>
    %cst_14 = arith.constant dense<0.000000e+00> : vector<2xf32>
    %48 = vector.multi_reduction <add>, %47, %cst_14 [1] : vector<2x64xf32> to vector<2xf32>
    %49 = vector.shape_cast %48 : vector<2xf32> to vector<2x1xf32>
    %cst_15 = arith.constant 5.000000e-01 : f32
    %50 = vector.broadcast %cst_15 : f32 to vector<2x1xf32>
    %51 = arith.mulf %50, %49 : vector<2x1xf32>
    %52 = math.tanh %51 : vector<2x1xf32>
    %cst_16 = arith.constant 1.000000e+00 : f32
    %53 = vector.broadcast %cst_16 : f32 to vector<2x1xf32>
    %54 = arith.addf %52, %53 : vector<2x1xf32>
    %cst_17 = arith.constant 5.000000e-01 : f32
    %55 = vector.broadcast %cst_17 : f32 to vector<2x1xf32>
    %56 = arith.mulf %55, %54 : vector<2x1xf32>
    %c0_18 = arith.constant 0 : index
    %c0_19 = arith.constant 0 : index
    %57 = vector.load %arg3[%c0_18, %c0_19] : memref<2x1xf32, #tpu.memory_space<vmem>>, vector<2x1xf32>
    tpu.vector_store %arg3[%c0_18, %c0_19], %56 {strides = array<i32>} : memref<2x1xf32, #tpu.memory_space<vmem>>, vector<2x1xf32>,
    return
  }
}

</mosaic_0001>

<bundles_post_ra>
// kernel: tpu_custom_call.1
= control target key start
LH: loop header
LB: loop body
LE: loop exit
PB: predicated region body
PF: predicated region fallthrough
CT: control target
= control target key end

     0   :  { %vm148_vm0 = vcmask 785408   ;;  %vm171_vm1 = vcmask 517120   ;;  %vm195_vm2 = vcmask 1024   ;;  %s354_s2 = inlined_call_operand.vmem [shape: bf16[240,64], index: 2, kind: input, shape index: {}]   ;;  %s355_s1 = inlined_call_operand.vmem [shape: f32[2,96], index: 1, kind: input, shape index: {}]   ;;  %s356_s0 = inlined_call_operand.vmem [shape: f32[2,128], index: 0, kind: input, shape index: {}]   ;;  %s357_s3 = inlined_call_operand.vmem [shape: f32[2,1], index: 3, kind: output, shape index: {}]  }
   0x1   :  { %v265_v0 = vld [vmem:[%s354_s2 + $0x38] sm:$0xff]  ;;  %v271_v1 = vld [vmem:[%s354_s2 + $0x68] sm:$0xff]  ;;  %v264_v2 = vld [vmem:[%s354_s2 + $0x30] sm:$0xff] }
   0x2   :  { %98 = vmatpush.bf16.msra.mxu0 %v265_v0  ;;  %154 = vmatpush.bf16.msra.mxu1 %v271_v1  ;;  %v270_v3 = vld [vmem:[%s354_s2 + $0x60] sm:$0xff]  ;;  %v263_v4 = vld [vmem:[%s354_s2 + $0x28] sm:$0xff]  ;;  %v269_v5 = vld [vmem:[%s354_s2 + $0x58] sm:$0xff] }
   0x3   :  { %v262_v6 = vld [vmem:[%s354_s2 + $0x20] sm:$0xff]  ;;  %v268_v7 = vld [vmem:[%s354_s2 + $0x50] sm:$0xff]  ;;  %v261_v8 = vld [vmem:[%s354_s2 + $0x18] sm:$0xff] }
   0x4   :  { %v267_v9 = vld [vmem:[%s354_s2 + $0x48] sm:$0xff]  ;;  %v260_v10 = vld [vmem:[%s354_s2 + $0x10] sm:$0xff]  ;;  %v266_v11 = vld [vmem:[%s354_s2 + $0x40] sm:$0xff] }
   0x5   :  { %v17_v12 = vld [vmem:[%s355_s1] sm:$0x3]  ;;  %v259_v14 = vld [vmem:[%s354_s2 + $0x8] sm:$0xff]  ;;  %v47_v18 = vld [vmem:[%s354_s2 + $0x70] sm:$0xf] }
   0x6   :  { %99 = vmatpush.bf16.msra.mxu0 %v264_v2  ;;  %155 = vmatpush.bf16.msra.mxu1 %v270_v3  ;;  %v18_v13 = vpack.c.bf16 %v17_v12, %v17_v12  ;;  %v258_v15 = vld [vmem:[%s354_s2] sm:$0xff]  ;;  %v48_v19 = vunpack.c.l.bf16 %v47_v18 }
   0x7   :  { %v15_v16 = vld [vmem:[%s356_s0] sm:$0x3] }
   0x8   :  { %v16_v17 = vpack.c.bf16 %v15_v16, %v15_v16  ;;  %v111_v21 = vperm.slane %v48_v19, 1  ;;  %v49_v22 = vperm.slane %v48_v19, 0  ;;  %v167_v29 = vperm.slane %v48_v19, 2 }
   0x9   :  { %v169_v30 = vperm.slane %v48_v19, 4  ;;  %v184_v44 = vperm.slane %v48_v19, 3  ;;  %v186_v46 = vperm.slane %v48_v19, 5 }
   0xa   :  { %100 = vmatpush.bf16.msra.mxu0 %v263_v4  ;;  %156 = vmatpush.bf16.msra.mxu1 %v269_v5 }
   0xe   :  { %101 = vmatpush.bf16.msra.mxu0 %v262_v6  ;;  %157 = vmatpush.bf16.msra.mxu1 %v268_v7 }
  0x12   :  { %102 = vmatpush.bf16.msra.mxu0 %v261_v8  ;;  %158 = vmatpush.bf16.msra.mxu1 %v267_v9 }
  0x16   :  { %103 = vmatpush.bf16.msra.mxu0 %v260_v10  ;;  %159 = vmatpush.bf16.msra.mxu1 %v266_v11 }
  0x19   :  { %257 = vmatmul.msk.bf16.vlgmr.msra.gmra.mxu1 %vm148_vm0, %v18_v13 }
  0x1a   :  { %104 = vmatpush.bf16.msra.mxu0 %v259_v14 }
  0x1e   :  { %105 = vmatpush.bf16.msra.mxu0 %v258_v15 }
  0x21   :  { %106 = vmatmul.bf16.vlgmr.msra.gmra.mxu0 %v16_v17 }
  0x96   :  { %v161_v20 = vpop.f32.mrf.mxu1 }
  0x97   :  { %v162_v23 = vadd.f32 %v161_v20, %v111_v21 }
  0x9e   :  { %v107_v24 = vpop.f32.mrf.mxu0  ;;  %v163_v25 = vpop.f32.mrf.mxu1 }
  0x9f   :  { %v108_v26 = vadd.f32 %v107_v24, %v49_v22 }
  0xa1   :  { %v165_v27 = vadd.f32 %v162_v23, %v108_v26 }
  0xa3   :  { %272 = vtanh.f32 %v165_v27 }
  0xa6   :  { %v109_v28 = vpop.f32.mrf.mxu0 }
  0xa9   :  { %v273_v31 = vpop.eup %272 }
  0xaa   :  { %v168_v32 = vmul.f32 %v273_v31, %v167_v29 }
  0xac   :  { %v170_v33 = vadd.f32 %v169_v30, %v168_v32 }
  0xae   :  { %v172_v34 = vsel %vm171_vm1, %v170_v33, 0.0 }
  0xaf   :  { %173 = vadd.xlane.f32.xlu0 %v172_v34 }
 0x122   :  { %v174_v35 = vpop.xlane.xlu0 %173 }
 0x123   :  { %v175_v36 = vmul.f32 0.5, %v174_v35 }
 0x125   :  { %274 = vtanh.f32 %v175_v36 }
 0x12b   :  { %v275_v37 = vpop.eup %274 }
 0x12c   :  { %v177_v38 = vadd.f32 1.0, %v275_v37 }
 0x12e   :  { %v178_v39 = vmul.f32 0.5, %v177_v38 }
 0x130   :  { %v180_v40 = vsub.f32 1.0, %v178_v39  ;;  %v179_v41 = vmul.f32 %v178_v39, %v108_v26 }
 0x132   :  { %v181_v42 = vmul.f32 %v180_v40, %v162_v23 }
 0x134   :  { %v182_v43 = vadd.f32 %v181_v42, %v179_v41 }
 0x136   :  { %v183_v45 = vmax.f32 %v182_v43, 0.0 }
 0x138   :  { %v185_v47 = vmul.f32 %v184_v44, %v183_v45 }
 0x13a   :  { %v187_v48 = vadd.f32 %v186_v46, %v185_v47 }
 0x13c   :  { %v188_v49 = vsel %vm171_vm1, %v187_v48, 0.0 }
 0x13d   :  { %189 = vadd.xlane.f32.xlu0 %v188_v49 }
 0x1b0   :  { %v190_v50 = vpop.xlane.xlu0 %189 }
 0x1b1   :  { %v191_v51 = vmul.f32 0.5, %v190_v50 }
 0x1b3   :  { %276 = vtanh.f32 %v191_v51 }
 0x1b9   :  { %v277_v52 = vpop.eup %276 }
 0x1ba   :  { %v193_v53 = vadd.f32 1.0, %v277_v52 }
 0x1bc   :  { %v194_v54 = vmul.f32 0.5, %v193_v53 }
 0x1be   :  { %196 = vst.msk [vmem:[%s357_s3] sm:$0x3] %vm195_vm2, %v194_v54 }

</bundles_post_ra>
